<compile_context>
chip_gen: v7x
topology: tpu7x:2x2x1
jax: 0.10.0
libtpu: 0.0.40
codegen_flags: <defaults>
</compile_context>

<pallas_src>
import jax
import jax.numpy as jnp
from jax import lax
from jax.experimental import pallas as pl
from jax.experimental.pallas import tpu as pltpu

_MIB = 1024 * 1024


def _round_up(x, m):
    return ((x + m - 1) // m) * m


def _physical_vmem_bytes():
    """Per-core physical VMEM; conservative (v7x-sized) fallback if unknown."""
    try:
        info = pltpu.get_tpu_info()
        v = getattr(info, "vmem_capacity_bytes", None)
        if v:
            return int(v)
    except Exception:
        pass
    return 64 * _MIB


def _make_logreg_kernel(d_total, tk, mask_tail):
    def kernel(x_ref, w_ref, b_ref, o_ref, acc_ref):
        # x_ref: (TB, TK) VMEM, w_ref: (1, TK) VMEM, b_ref: (1,) SMEM
        # o_ref: (1, TB) VMEM (lane-dense), acc_ref: (1, TB) f32 VMEM scratch
        k = pl.program_id(1)

        @pl.when(k == 0)
        def _():
            acc_ref[...] = jnp.zeros_like(acc_ref)

        x = x_ref[...]
        w = w_ref[...]
        if mask_tail:
            # Ragged last K block: lanes >= valid hold stale VMEM garbage in
            # BOTH x and w; zero them so nothing pollutes the accumulator.
            valid = d_total - k * tk
            lane_x = lax.broadcasted_iota(jnp.int32, x.shape, 1)
            x = jnp.where(lane_x < valid, x, 0.0)
            lane_w = lax.broadcasted_iota(jnp.int32, w.shape, 1)
            w = jnp.where(lane_w < valid, w, 0.0)

        # (1, TK) . (TB, TK) contracting the minor dim of both -> (1, TB).
        acc_ref[...] += lax.dot_general(
            w,
            x,
            dimension_numbers=(((1,), (1,)), ((), ())),
            preferred_element_type=jnp.float32,
        )

        @pl.when(k == pl.num_programs(1) - 1)
        def _():
            o_ref[...] = jax.nn.sigmoid(acc_ref[...] + b_ref[0]).astype(o_ref.dtype)

    return kernel


def logistic_regression_forward(x, weight, bias):
    """x: (B, D) f32, weight: (1, D) f32, bias: (1,) f32 -> (B, 1) f32."""
    B, D = x.shape
    itemsize = jnp.dtype(x.dtype).itemsize
    d_pad = _round_up(D, 128)          # lane-padded feature extent in VMEM
    b128 = _round_up(B, 128)

    # --- generation-aware per-buffer target for the streamed x tile ---------
    phys_vmem = _physical_vmem_bytes()
    if phys_vmem >= 96 * _MIB:         # v5e / v6e: 128 MiB physical VMEM
        per_buf = 12 * _MIB
    elif phys_vmem >= 48 * _MIB:       # v7x: 64 MiB physical per TensorCore
        per_buf = 14 * _MIB
    else:                              # unknown / small part: stay modest
        per_buf = 6 * _MIB

    # --- choose (TB, TK): ~per_buf bytes of x per grid step ------------------
    rows_full_d = (per_buf // (d_pad * itemsize)) // 128 * 128
    if rows_full_d >= 128:
        tk = D                          # whole feature dim per step, no K tiling
        tb = min(max(rows_full_d, 128), b128)
    else:
        # Very large D: tile the contraction (K axis) with a f32 accumulator.
        tb = min(b128, 256)
        tk = max(128, (per_buf // (tb * itemsize)) // 128 * 128)
        tk = min(tk, d_pad)
    # Feed both v7x TensorCores: >= 2 batch tiles whenever the batch allows it.
    if b128 >= 256:
        tb = min(tb, _round_up(b128 // 2, 128))

    num_btiles = pl.cdiv(B, tb)
    num_ktiles = pl.cdiv(D, tk)
    b_out = num_btiles * tb             # output slab width (lane-dense, tiled)
    mask_tail = (num_ktiles > 1) and (D % tk != 0)

    # --- explicit scoped-VMEM budget (lane-padded, 2x double-buffered) -------
    tk_lanes = _round_up(tk, 128)
    x_buf = tb * tk_lanes * itemsize
    aux = 4 * (8 * tb * 4)              # acc + double-buffered out block (+ slack)
    w_buf = 2 * (8 * tk_lanes * itemsize)
    vmem_limit = 2 * x_buf + aux + w_buf + 4 * _MIB
    vmem_limit = int(min(max(vmem_limit, 32 * _MIB), (phys_vmem * 3) // 4))

    kernel = _make_logreg_kernel(D, tk, mask_tail)

    out = pl.pallas_call(
        kernel,
        out_shape=jax.ShapeDtypeStruct((1, b_out), x.dtype),
        grid=(num_btiles, num_ktiles),
        in_specs=[
            pl.BlockSpec((tb, tk), lambda i, k: (i, k)),   # x: streamed per tile
            pl.BlockSpec((1, tk), lambda i, k: (0, k)),    # weight: tiny per-K slice
            pl.BlockSpec(memory_space=pltpu.SMEM),         # bias: scalar in SMEM
        ],
        out_specs=pl.BlockSpec((1, tb), lambda i, k: (0, i)),  # lane-dense output
        scratch_shapes=[pltpu.VMEM((1, tb), jnp.float32)],     # f32 accumulator
        compiler_params=pltpu.CompilerParams(
            dimension_semantics=("parallel", "arbitrary"),
            vmem_limit_bytes=vmem_limit,
        ),
        cost_estimate=pl.CostEstimate(
            flops=2 * B * D,
            transcendentals=B,
            bytes_accessed=(B * D + D + 1 + B) * itemsize,
        ),
    )(x, weight, bias)

    # (1, b_out) lane-dense slab -> (B, 1) like torch.sigmoid(nn.Linear(x)).
    return out[0, :B].reshape(B, 1)


if __name__ == "__main__":
    key = jax.random.PRNGKey(0)
    kx, kw, kb = jax.random.split(key, 3)

    batch = 8
    input_size = 32

    x = jax.random.normal(kx, (batch, input_size), dtype=jnp.float32)

    # Deterministic init mimicking torch.nn.Linear's U(-1/sqrt(D), 1/sqrt(D)).
    bound = 1.0 / jnp.sqrt(jnp.float32(input_size))
    weight = jax.random.uniform(
        kw, (1, input_size), minval=-bound, maxval=bound, dtype=jnp.float32
    )
    bias = jax.random.uniform(
        kb, (1,), minval=-bound, maxval=bound, dtype=jnp.float32
    )

    out = logistic_regression_forward(x, weight, bias)
    out = jax.block_until_ready(out)

    # Reference check in plain JAX (matches torch.sigmoid(nn.Linear(x))).
    ref = jax.nn.sigmoid(x @ weight.T + bias)
    assert out.shape == (batch, 1)
    assert jnp.allclose(out, ref, atol=1e-5, rtol=1e-5)

    print("KERNEL_OK")
</pallas_src>

<mosaic_0001>
module attributes {stable_mosaic.version = 11 : i64} {
  func.func @kernel(%arg0: i32, %arg1: i32, %arg2: memref<128x32xf32, #tpu.memory_space<vmem>>, %arg3: memref<1x32xf32, #tpu.memory_space<vmem>>, %arg4: memref<1xf32, #tpu.memory_space<smem>>, %arg5: memref<1x128xf32, #tpu.memory_space<vmem>>, %arg6: memref<1x128xf32, #tpu.memory_space<vmem>>) attributes {dimension_semantics = [#tpu.dimension_semantics<parallel>, #tpu.dimension_semantics<arbitrary>], iteration_bounds = array<i64: 1, 1>, scalar_prefetch = 0 : i64, scratch_operands = 1 : i64, tpu.core_type = #tpu.core_type<tc>, window_params = [{transform_indices = @transform_0, window_bounds = array<i64: 128, 32>}, {transform_indices = @transform_1, window_bounds = array<i64: 1, 32>}, {transform_indices = @transform_2, window_bounds = array<i64: 1>}, {transform_indices = @transform_3, window_bounds = array<i64: 1, 128>}]} {
    %c0_i32 = arith.constant 0 : i32
    %0 = arith.cmpi eq, %arg1, %c0_i32 : i32
    %1 = arith.extui %0 : i1 to i32
    %c0_i32_0 = arith.constant 0 : i32
    %2 = arith.cmpi ne, %1, %c0_i32_0 : i32
    scf.if %2 {
      %cst_10 = arith.constant 0.000000e+00 : f32
      %12 = vector.broadcast %cst_10 : f32 to vector<1x128xf32>
      %c0_11 = arith.constant 0 : index
      %c0_12 = arith.constant 0 : index
      %13 = vector.load %arg6[%c0_11, %c0_12] : memref<1x128xf32, #tpu.memory_space<vmem>>, vector<1x128xf32>
      tpu.vector_store %arg6[%c0_11, %c0_12], %12 {strides = array<i32>} : memref<1x128xf32, #tpu.memory_space<vmem>>, vector<1x128xf32>,
    } else {
    }
    %c0 = arith.constant 0 : index
    %c0_1 = arith.constant 0 : index
    %3 = vector.load %arg2[%c0, %c0_1] : memref<128x32xf32, #tpu.memory_space<vmem>>, vector<128x32xf32>
    %c0_2 = arith.constant 0 : index
    %c0_3 = arith.constant 0 : index
    %4 = vector.load %arg3[%c0_2, %c0_3] : memref<1x32xf32, #tpu.memory_space<vmem>>, vector<1x32xf32>
    %c0_4 = arith.constant 0 : index
    %c0_5 = arith.constant 0 : index
    %5 = vector.load %arg6[%c0_4, %c0_5] : memref<1x128xf32, #tpu.memory_space<vmem>>, vector<1x128xf32>
    %cst = arith.constant dense<0.000000e+00> : vector<1x128xf32>
    %6 = tpu.matmul %4, %3, %cst {dimension_numbers = #tpu.dot_dimension_numbers<[1], [1], [0], [0], [0, 0, 1, 0], [], []>} : vector<1x32xf32>, vector<128x32xf32>, vector<1x128xf32> -> vector<1x128xf32>
    %7 = arith.addf %5, %6 : vector<1x128xf32>
    %c0_6 = arith.constant 0 : index
    %c0_7 = arith.constant 0 : index
    %8 = vector.load %arg6[%c0_6, %c0_7] : memref<1x128xf32, #tpu.memory_space<vmem>>, vector<1x128xf32>
    tpu.vector_store %arg6[%c0_6, %c0_7], %7 {strides = array<i32>} : memref<1x128xf32, #tpu.memory_space<vmem>>, vector<1x128xf32>,
    %c0_i32_8 = arith.constant 0 : i32
    %9 = arith.cmpi eq, %arg1, %c0_i32_8 : i32
    %10 = arith.extui %9 : i1 to i32
    %c0_i32_9 = arith.constant 0 : i32
    %11 = arith.cmpi ne, %10, %c0_i32_9 : i32
    scf.if %11 {
      %c0_10 = arith.constant 0 : index
      %c0_11 = arith.constant 0 : index
      %12 = vector.load %arg6[%c0_10, %c0_11] : memref<1x128xf32, #tpu.memory_space<vmem>>, vector<1x128xf32>
      %c0_12 = arith.constant 0 : index
      %13 = memref.load %arg4[%c0_12] : memref<1xf32, #tpu.memory_space<smem>>
      %14 = vector.broadcast %13 : f32 to vector<1x128xf32>
      %15 = arith.addf %12, %14 : vector<1x128xf32>
      %16 = arith.negf %15 : vector<1x128xf32>
      %17 = math.exp %16 : vector<1x128xf32>
      %cst_13 = arith.constant 1.000000e+00 : f32
      %18 = vector.broadcast %cst_13 : f32 to vector<1x128xf32>
      %19 = arith.addf %18, %17 : vector<1x128xf32>
      %20 = arith.divf %18, %19 : vector<1x128xf32>
      %c0_14 = arith.constant 0 : index
      %c0_15 = arith.constant 0 : index
      %21 = vector.load %arg5[%c0_14, %c0_15] : memref<1x128xf32, #tpu.memory_space<vmem>>, vector<1x128xf32>
      tpu.vector_store %arg5[%c0_14, %c0_15], %20 {strides = array<i32>} : memref<1x128xf32, #tpu.memory_space<vmem>>, vector<1x128xf32>,
    } else {
    }
    return
  }
  func.func @transform_0(%arg0: i32, %arg1: i32) -> (i32, i32) {
    %c0_i32 = arith.constant 0 : i32
    return %arg0, %arg1 : i32, i32
  }
  func.func @transform_1(%arg0: i32, %arg1: i32) -> (i32, i32) {
    %c0_i32 = arith.constant 0 : i32
    %c0_i32_0 = arith.constant 0 : i32
    return %c0_i32, %arg1 : i32, i32
  }
  func.func @transform_2(%arg0: i32, %arg1: i32) -> i32 {
    %c0_i32 = arith.constant 0 : i32
    %c0_i32_0 = arith.constant 0 : i32
    return %c0_i32 : i32
  }
  func.func @transform_3(%arg0: i32, %arg1: i32) -> (i32, i32) {
    %c0_i32 = arith.constant 0 : i32
    %c0_i32_0 = arith.constant 0 : i32
    return %c0_i32, %arg0 : i32, i32
  }
}

</mosaic_0001>

<bundles_post_ra>
// kernel: tpu_custom_call.1
= control target key start
LH: loop header
LB: loop body
LE: loop exit
PB: predicated region body
PF: predicated region fallthrough
CT: control target
= control target key end

     0   :  { %9 = vsyncpa [#allocation5], 0  ;;  %s447_s0 = inlined_call_operand.hbm [shape: f32[8,32], index: 0, kind: input, shape index: {}]   ;;  %s448_s1 = inlined_call_operand.vmem [shape: f32[1,32], index: 1, kind: input, shape index: {}]   ;;  %s449_s2 = inlined_call_operand.<no memory space> [shape: f32[1], index: 2, kind: input, shape index: {}]   ;;  %s450_s3 = inlined_call_operand.hbm [shape: f32[1,128], index: 3, kind: output, shape index: {}]  }
   0x1   :  { %10 = vsyncpa [#allocation6], 0 }
   0x2   :  { %15 = vsyncadd [#allocation5], 1920  ;;  %s367_s12 = smov [#allocation4]   ;;  %s319_s16 = scalar_lea.hbm %s447_s0, 128 }
   0x3   :  { %s16_s13 = sshll.u32 %s367_s12, 4  ;;  %p320_p0 = scmp.ne.s32.totalorder %s447_s0, %s319_s16  ;;  %s17_s13 = int_to_ptr.vmem [resolvable:$true] %s16_s13 }
   0x4   :  { %p323_p1 = scmp.lt.u32.totalorder %s319_s16, %s447_s0 }
   0x6   :  { %p325_p2 = pnand %p323_p1, %p320_p0 }
   0x8   :  { %328 = shalt.err (!%p325_p2)
}
   0x9   :  { %s329_s21 = scalar_lea.vmem %s17_s13, 128  ;;  %s333_s22 = scalar_lea.vmem %s17_s13, 2048 }
   0xa   :  { %p330_p3 = scmp.ne.s32.totalorder %s17_s13, %s329_s21  ;;  %p334_p4 = scmp.lt.s32.totalorder %s17_s13, %s17_s13 }
   0xb   :  { %p335_p5 = scmp.lt.s32.totalorder %s333_s22, %s329_s21 }
   0xd   :  { %p336_p6 = por %p335_p5, %p334_p4 }
   0xf   :  { %p337_p7 = pnand %p336_p6, %p330_p3 }
  0x11   :  { %340 = shalt.err (!%p337_p7)
}
  0x12   :  { %s368_s23 = smov 128   ;;  %s369_s24 = smov 8  }
  0x13   :  { %22 = dma.hbm_to_vmem [thread:$0]  %s447_s0, 128, %s17_s13, [#allocation5], %s368_s23, %s368_s23, %s369_s24  }
  0x14   :  { %363 = dma.done.wait [#allocation5], 2048  }
  0x15   :  { %364 = vsyncadd [#allocation5], 4294965248  ;;  %v370_v0 = vmov 0.0|0.0   ;;  %v371_v1 = vmov 0.0   ;;  %vm372_vm0 = vmmov 0   ;;  %vm53_vm1 = vcmask 261120  }
  0x16   :  { %276 = vmatprep.subr.bf16.mxu0 %v370_v0  ;;  %34 = vst [vmem:[#allocation2] sm:$0x1] %v371_v1  ;;  %273 = vmatprep.mubr.msk.f32.mxu0 %vm372_vm0, %v371_v1  ;;  %v35_v2 = vld [vmem:[#allocation4] sm:$0xff]  ;;  %v36_v3 = vld [vmem:[#allocation4 + $0x8] sm:$0xff]  ;;  %vm408_vm2 = vmpackc.low %vm53_vm1, %vm53_vm1  ;;  %v182_v32 = vstv %s449_s2  ;;  %s373_s30 = smov [#allocation7]  }
  0x17   :  { %v277_v5 = vpack.c.bf16 %v36_v3, %v35_v2  ;;  %v37_v6 = vld [vmem:[#allocation4 + $0x10] sm:$0xff]  ;;  %v38_v7 = vld [vmem:[#allocation4 + $0x18] sm:$0xff]  ;;  %v39_v9 = vld [vmem:[#allocation4 + $0x20] sm:$0xff] }
  0x18   :  { %v281_v8 = vpack.c.bf16 %v38_v7, %v37_v6  ;;  %v40_v10 = vld [vmem:[#allocation4 + $0x28] sm:$0xff]  ;;  %v41_v12 = vld [vmem:[#allocation4 + $0x30] sm:$0xff]  ;;  %v42_v13 = vld [vmem:[#allocation4 + $0x38] sm:$0xff] }
  0x19   :  { %279 = vmatpush3.bf16.xpose.msk.msra.mxu0 %vm408_vm2, %v277_v5  ;;  %v285_v11 = vpack.c.bf16 %v40_v10, %v39_v9  ;;  %v289_v14 = vpack.c.bf16 %v42_v13, %v41_v12  ;;  %v43_v15 = vld [vmem:[#allocation4 + $0x40] sm:$0xff]  ;;  %v44_v16 = vld [vmem:[#allocation4 + $0x48] sm:$0xff]  ;;  %v45_v18 = vld [vmem:[#allocation4 + $0x50] sm:$0xff] }
  0x1a   :  { %280 = vmatprep.subr.bf16.mxu0 %v370_v0  ;;  %v293_v17 = vpack.c.bf16 %v44_v16, %v43_v15  ;;  %v46_v19 = vld [vmem:[#allocation4 + $0x58] sm:$0xff]  ;;  %v47_v21 = vld [vmem:[#allocation4 + $0x60] sm:$0xff]  ;;  %v48_v22 = vld [vmem:[#allocation4 + $0x68] sm:$0xff] }
  0x1b   :  { %v297_v20 = vpack.c.bf16 %v46_v19, %v45_v18  ;;  %v301_v23 = vpack.c.bf16 %v48_v22, %v47_v21  ;;  %v49_v24 = vld [vmem:[#allocation4 + $0x70] sm:$0xff]  ;;  %v50_v25 = vld [vmem:[#allocation4 + $0x78] sm:$0xff] }
  0x1c   :  { %v305_v26 = vpack.c.bf16 %v50_v25, %v49_v24  ;;  %v51_v27 = vld [vmem:[%s448_s1] sm:$0x1]  ;;  %s197_s1 = sshll.u32 %s373_s30, 4  ;;  %s198_s1 = int_to_ptr.vmem [resolvable:$true] %s197_s1 }
  0x1d   :  { %v52_v28 = vld [vmem:[#allocation2] sm:$0x1]  ;;  %s341_s4 = scalar_lea.vmem %s198_s1, 16  ;;  %s345_s5 = scalar_lea.vmem %s198_s1, 32 }
  0x1e   :  { %p342_p8 = scmp.ne.s32.totalorder %s198_s1, %s341_s4  ;;  %p346_p9 = scmp.lt.s32.totalorder %s198_s1, %s198_s1 }
  0x1f   :  { %p347_p10 = scmp.lt.s32.totalorder %s345_s5, %s341_s4 }
  0x21   :  { %283 = vmatpush3.bf16.xpose.msk.msra.mxu0 %vm408_vm2, %v281_v8  ;;  %p348_p11 = por %p347_p10, %p346_p9 }
  0x22   :  { %284 = vmatprep.subr.bf16.mxu0 %v370_v0 }
  0x23   :  { %p349_p12 = pnand %p348_p11, %p342_p8 }
  0x29   :  { %287 = vmatpush3.bf16.xpose.msk.msra.mxu0 %vm408_vm2, %v285_v11 }
  0x2a   :  { %288 = vmatprep.subr.bf16.mxu0 %v370_v0 }
  0x31   :  { %291 = vmatpush3.bf16.xpose.msk.msra.mxu0 %vm408_vm2, %v289_v14 }
  0x32   :  { %292 = vmatprep.subr.bf16.mxu0 %v370_v0 }
  0x39   :  { %295 = vmatpush3.bf16.xpose.msk.msra.mxu0 %vm408_vm2, %v293_v17 }
  0x3a   :  { %296 = vmatprep.subr.bf16.mxu0 %v370_v0 }
  0x41   :  { %299 = vmatpush3.bf16.xpose.msk.msra.mxu0 %vm408_vm2, %v297_v20 }
  0x42   :  { %300 = vmatprep.subr.bf16.mxu0 %v370_v0 }
  0x49   :  { %303 = vmatpush3.bf16.xpose.msk.msra.mxu0 %vm408_vm2, %v301_v23 }
  0x4a   :  { %304 = vmatprep.subr.bf16.mxu0 %v370_v0 }
  0x51   :  { %307 = vmatpush3.bf16.xpose.msk.msra.mxu0 %vm408_vm2, %v305_v26 }
  0x58   :  { %274 = vmatmul.mubr.msk.f32.vlgmr.msra.gmra.mrb[0].mxu0 %vm53_vm1, %v51_v27 }
 0x12b   :  { %v171_v29 = vpop.f32.mrb[0].mxu0 }
 0x12c   :  { %v175_v30 = vadd.f32 %v171_v29, %v52_v28  ;;  %v275_v31 = vpop.f32.mrb[1].mxu0 }
 0x12e   :  { %176 = vst [vmem:[#allocation2] sm:$0x1] %v175_v30 }
 0x135   :  { %v180_v33 = vld [vmem:[#allocation2] sm:$0x1] }
 0x136   :  { %v183_v34 = vadd.f32 %v182_v32, %v180_v33 }
 0x138   :  { %v223_v35 = vmul.f32 -1.442695, %v183_v34 }
 0x13a   :  { %315 = vpow2.f32 %v223_v35 }
 0x144   :  { %v316_v36 = vpop.eup %315 }
 0x145   :  { %v187_v37 = vadd.f32 1.0, %v316_v36 }
 0x147   :  { %317 = vrcp.f32 %v187_v37 }
 0x151   :  { %v318_v38 = vpop.eup %317 }
 0x152   :  { %190 = vst [vmem:[#allocation7] sm:$0x1] %v318_v38 }
 0x153   :  { %352 = shalt.err (!%p349_p12)
}
 0x154   :  { %s353_s7 = scalar_lea.hbm %s450_s3, 16 }
 0x155   :  { %p354_p13 = scmp.ne.s32.totalorder %s450_s3, %s353_s7  ;;  %p357_p0 = scmp.lt.u32.totalorder %s353_s7, %s450_s3 }
 0x157   :  { %p359_p1 = pnand %p357_p0, %p354_p13 }
 0x159   :  { %362 = shalt.err (!%p359_p1)
}
 0x15a   :  { %200 = dma.vmem_to_hbm [thread:$0]  %s198_s1, 16, %s450_s3, [#allocation6]  }
 0x15b   :  { %365 = dma.done.wait [#allocation6], 16  }
 0x15c   :  { %366 = vsyncadd [#allocation6], 4294967280 }
 0x15d   :  { %204 = vsyncpa [#allocation5], 1 }
 0x15e   :  { %205 = vsyncpa [#allocation6], 1 }

</bundles_post_ra>
